<compile_context>
chip_gen: v7x
topology: tpu7x:2x2x1
jax: 0.10.0
libtpu: 0.0.40
codegen_flags: <defaults>
</compile_context>

<pallas_src>
import functools
import numpy as np

import jax
import jax.numpy as jnp
from jax import lax
from jax.experimental import pallas as pl
from jax.experimental.pallas import tpu as pltpu


def _round_up(x: int, m: int) -> int:
    return (x + m - 1) // m * m


# ---------------------------------------------------------------------------
# Pallas kernels (hot path)
# ---------------------------------------------------------------------------

def _pairlist_kernel(pos_i_ref, sub_i_ref, pos_jt_ref, sub_jt_ref, d_ref, *, cutoff):
    """One (TI, TJ) tile of the masked all-pairs distance matrix.

    pos_i_ref : (TI, 3) f32   row-block of positions (i side)
    sub_i_ref : (TI, 1) i32   row-block of subsystem indices
    pos_jt_ref: (3, TJ) f32   column-block of transposed positions (j side)
    sub_jt_ref: (1, TJ) i32   column-block of subsystem indices
    d_ref     : (TI, TJ) f32  d(i,j) if (same subsystem & i<j & d<cutoff) else +inf
    """
    TI = pos_i_ref.shape[0]
    TJ = pos_jt_ref.shape[1]

    xi = pos_i_ref[:, 0:1]          # (TI, 1)
    yi = pos_i_ref[:, 1:2]
    zi = pos_i_ref[:, 2:3]
    xj = pos_jt_ref[0:1, :]         # (1, TJ)  lane-dense, no transpose needed
    yj = pos_jt_ref[1:2, :]
    zj = pos_jt_ref[2:3, :]

    dx = xi - xj                    # (TI, TJ) broadcasts, pure VPU
    dy = yi - yj
    dz = zi - zj
    d2 = dx * dx + dy * dy + dz * dz

    same = sub_i_ref[...] == sub_jt_ref[...]          # (TI,1)==(1,TJ) -> (TI,TJ)
    gi = pl.program_id(0) * TI
    gj = pl.program_id(1) * TJ
    ii = gi + lax.broadcasted_iota(jnp.int32, (TI, TJ), 0)
    jj = gj + lax.broadcasted_iota(jnp.int32, (TI, TJ), 1)

    # squared-distance compare: mask does not wait on the EUP sqrt
    neighbor = same & (ii < jj) & (d2 < jnp.float32(cutoff * cutoff))
    d_ref[...] = jnp.where(neighbor, jnp.sqrt(d2), jnp.float32(jnp.inf))


def _embedding_gather_kernel(z_sm_ref, row_ref, out_ref):
    """SlicedEmbedding row gather: table[z[i]] was DMA'd in by the BlockSpec.

    z_sm_ref : (N,) i32 in SMEM (consumed by the index_map only)
    row_ref  : (1, 1, Ep) f32 — row z[i] of the padded embedding table
    out_ref  : (1, 1, Ep) f32
    """
    del z_sm_ref
    out_ref[...] = row_ref[...]


# ---------------------------------------------------------------------------
# pallas_call wrappers
# ---------------------------------------------------------------------------

def _pairlist_masked_distance(pos_pad, sub_pad, *, cutoff, tile):
    """Returns (Np, Np) f32: distance for valid neighbor pairs, +inf otherwise."""
    Np = pos_pad.shape[0]
    grid = (Np // tile, Np // tile)
    return pl.pallas_call(
        functools.partial(_pairlist_kernel, cutoff=cutoff),
        out_shape=jax.ShapeDtypeStruct((Np, Np), jnp.float32),
        grid_spec=pltpu.PrefetchScalarGridSpec(
            num_scalar_prefetch=0,
            grid=grid,
            in_specs=[
                pl.BlockSpec((tile, 3), lambda i, j: (i, 0)),   # row positions
                pl.BlockSpec((tile, 1), lambda i, j: (i, 0)),   # row subsystems
                pl.BlockSpec((3, tile), lambda i, j: (0, j)),   # col positions^T
                pl.BlockSpec((1, tile), lambda i, j: (0, j)),   # col subsystems
            ],
            out_specs=pl.BlockSpec((tile, tile), lambda i, j: (i, j)),
        ),
        compiler_params=pltpu.CompilerParams(
            dimension_semantics=("parallel", "parallel")),
    )(pos_pad, sub_pad.reshape(Np, 1), pos_pad.T, sub_pad.reshape(1, Np))


def _embedding_gather(atomic_numbers_i32, emb_table_padded_3d):
    """Scalar-prefetch DMA gather: out[i] = table[z[i]].  Returns (N, 1, Ep)."""
    N = atomic_numbers_i32.shape[0]
    V, _, Ep = emb_table_padded_3d.shape
    return pl.pallas_call(
        _embedding_gather_kernel,
        out_shape=jax.ShapeDtypeStruct((N, 1, Ep), jnp.float32),
        grid_spec=pltpu.PrefetchScalarGridSpec(
            num_scalar_prefetch=1,
            grid=(N,),
            in_specs=[pl.BlockSpec((1, 1, Ep), lambda i, z_ref: (z_ref[i], 0, 0))],
            out_specs=pl.BlockSpec((1, 1, Ep), lambda i, z_ref: (i, 0, 0)),
        ),
        compiler_params=pltpu.CompilerParams(dimension_semantics=("parallel",)),
    )(atomic_numbers_i32, emb_table_padded_3d)


@functools.partial(jax.jit, static_argnames=("cutoff", "max_pairs"))
def prepare_inputs(positions, sub_idx, atomic_numbers, emb_table, *, cutoff, max_pairs):
    """Runs both Pallas kernels + on-device pair compaction inside one jit.

    Returns:
      pair_indices : (2, max_pairs) i32   (row-major i<j order; padded past n_pairs)
      d_ij         : (max_pairs,)   f32
      r_ij         : (max_pairs, 3) f32
      n_pairs      : ()             i32   actual number of valid pairs
      emb          : (N, E)         f32   per-atom embedding
    """
    N = positions.shape[0]
    V, E = emb_table.shape

    # ---------------- PairList ----------------
    tile = min(256, _round_up(max(N, 1), 128))       # fits comfortably in v7x VMEM
    Np = _round_up(max(N, 1), tile)
    pad = Np - N
    pos_pad = jnp.pad(positions.astype(jnp.float32), ((0, pad), (0, 0)))
    # padded atoms get unique negative subsystem ids -> never form pairs
    pad_ids = -(jnp.arange(pad, dtype=jnp.int32) + 1)
    sub_pad = jnp.concatenate([sub_idx.astype(jnp.int32), pad_ids])

    d_dense = _pairlist_masked_distance(pos_pad, sub_pad, cutoff=cutoff, tile=tile)

    # on-device dense -> sparse compaction (no dense host transfer)
    neighbor = d_dense < jnp.float32(cutoff)
    n_pairs = jnp.count_nonzero(neighbor).astype(jnp.int32)
    i_idx, j_idx = jnp.nonzero(neighbor, size=max_pairs, fill_value=0)
    pair_indices = jnp.stack([i_idx, j_idx]).astype(jnp.int32)
    d_ij = d_dense[i_idx, j_idx]
    r_ij = pos_pad[i_idx] - pos_pad[j_idx]

    # ---------------- SlicedEmbedding ----------------
    Ep = _round_up(E, 128)                            # lane-dense table / output
    table_p = jnp.pad(emb_table.astype(jnp.float32),
                      ((0, 0), (0, Ep - E))).reshape(V, 1, Ep)
    # TODO(synk): nn.Embedding raises on out-of-range indices; here they are clipped.
    z = jnp.clip(atomic_numbers.astype(jnp.int32), 0, V - 1)
    emb = _embedding_gather(z, table_p)[:, 0, :E]

    return pair_indices, d_ij, r_ij, n_pairs, emb


# ---------------------------------------------------------------------------
# BaseNNP equivalent (glue)
# ---------------------------------------------------------------------------

class BaseNNPPallas:
    def __init__(self, max_Z: int, embedding_dim: int, cutoff: float = 5.0):
        assert embedding_dim > 0, "embedding_dim must be > 0"
        self.cutoff = float(cutoff)
        self.nr_atom_basis = int(embedding_dim)
        # Deterministic synthetic embedding table (like nn.Embedding weights).
        key = jax.random.PRNGKey(0)
        self.embedding_table = jax.random.normal(
            key, (max_Z, embedding_dim), dtype=jnp.float32
        )

    def input_checks(self, inputs):
        required_keys = ["atomic_numbers", "positions", "atomic_subsystem_indices"]
        for key in required_keys:
            if key not in inputs:
                raise ValueError(f"Missing required key: {key}")
        if inputs["atomic_numbers"].ndim != 2:
            raise ValueError("Shape mismatch: 'atomic_numbers' should be a 2D tensor.")
        if inputs["positions"].ndim != 2:
            raise ValueError("Shape mismatch: 'positions' should be a 2D tensor.")

    def forward(self, inputs):
        self.input_checks(inputs)
        atomic_numbers = inputs["atomic_numbers"]        # (N, 1) int
        positions = inputs["positions"]                  # (N, 3) float
        sub_idx = inputs["atomic_subsystem_indices"]     # (N,)   int
        N = atomic_numbers.shape[0]

        # static worst-case pair count (pass a tighter bound for large systems)
        max_pairs = max(N * (N - 1) // 2, 1)

        pair_indices, d_ij, r_ij, n_pairs, emb = prepare_inputs(
            jnp.asarray(positions, jnp.float32),
            jnp.asarray(sub_idx, jnp.int32),
            jnp.asarray(atomic_numbers, jnp.int32).reshape(N),
            self.embedding_table,
            cutoff=self.cutoff,
            max_pairs=max_pairs,
        )
        assert emb.shape == (N, self.nr_atom_basis)

        # single host sync: only the scalar count + compacted O(n_pairs) arrays
        n = int(n_pairs)
        pair_indices = pair_indices[:, :n]
        d_ij = d_ij[:n]
        r_ij = r_ij[:n]

        kernel_inputs = {
            "pair_indices": pair_indices,
            "d_ij": d_ij,
            "r_ij": r_ij,
            "atomic_numbers_embedding": emb,
            "positions": jnp.asarray(positions, jnp.float32),
            "atomic_numbers": jnp.asarray(atomic_numbers),
            "atomic_subsystem_indices": jnp.asarray(sub_idx, jnp.int32),
        }
        return self._forward(kernel_inputs)

    def _forward(self, inputs):
        # TODO(synk): _forward is abstract in the reference (BaseNNP is an ABC);
        # a simple per-system sum over per-atom embedding scalars is used here.
        sub_idx = inputs["atomic_subsystem_indices"]
        per_atom = jnp.sum(inputs["atomic_numbers_embedding"], axis=-1)
        n_systems = int(jnp.max(sub_idx)) + 1
        energies = jnp.zeros((n_systems,), jnp.float32).at[sub_idx].add(per_atom)
        return energies, inputs


# ---------------------------------------------------------------------------
# Main
# ---------------------------------------------------------------------------

if __name__ == "__main__":
    key = jax.random.PRNGKey(0)
    k_pos, k_z = jax.random.split(key)

    n_atoms = 8                      # two subsystems of 4 atoms each
    max_Z = 16
    embedding_dim = 32
    cutoff = 5.0

    positions = jax.random.uniform(
        k_pos, (n_atoms, 3), dtype=jnp.float32, minval=0.0, maxval=4.0
    )
    atomic_numbers = jax.random.randint(k_z, (n_atoms, 1), 1, 10, dtype=jnp.int32)
    atomic_subsystem_indices = jnp.array([0, 0, 0, 0, 1, 1, 1, 1], dtype=jnp.int32)

    model = BaseNNPPallas(max_Z=max_Z, embedding_dim=embedding_dim, cutoff=cutoff)
    energies, kernel_inputs = model.forward(
        {
            "atomic_numbers": atomic_numbers,
            "positions": positions,
            "atomic_subsystem_indices": atomic_subsystem_indices,
            "total_charge": jnp.zeros((2, 1), dtype=jnp.int32),
        }
    )
    energies = jax.block_until_ready(energies)

    # --- sanity check against a plain numpy reference ----------------------
    pos_np = np.asarray(positions)
    sub_np = np.asarray(atomic_subsystem_indices)
    diff_ref = pos_np[:, None, :] - pos_np[None, :, :]
    d_ref = np.linalg.norm(diff_ref, axis=-1)
    same = sub_np[:, None] == sub_np[None, :]
    upper = np.triu(np.ones((n_atoms, n_atoms), dtype=bool), k=1)
    mask_ref = same & upper & (d_ref < cutoff)
    ii, jj = np.nonzero(mask_ref)
    pidx = np.asarray(kernel_inputs["pair_indices"])
    assert pidx.shape == (2, ii.shape[0])
    assert np.array_equal(pidx, np.stack([ii, jj]))
    assert np.allclose(np.asarray(kernel_inputs["d_ij"]), d_ref[ii, jj], atol=1e-5)
    assert np.allclose(np.asarray(kernel_inputs["r_ij"]), diff_ref[ii, jj], atol=1e-5)
    emb_ref = np.asarray(model.embedding_table)[np.asarray(atomic_numbers)[:, 0]]
    assert np.allclose(
        np.asarray(kernel_inputs["atomic_numbers_embedding"]), emb_ref, atol=1e-5
    )
    assert np.isfinite(np.asarray(energies)).all()

    print("KERNEL_OK")
</pallas_src>

<mosaic_0001>
module attributes {stable_mosaic.version = 11 : i64} {
  func.func private @main(%arg0: i32) attributes {dimension_semantics = [#tpu.dimension_semantics<core_parallel>], iteration_bounds = array<i64: 2>, tpu.core_type = #tpu.core_type<sc_scalar_subcore>, window_params = []} {
    return
  }
}

module attributes {stable_mosaic.version = 11 : i64} {
  func.func private @main(%arg0: i32) attributes {dimension_semantics = [#tpu.dimension_semantics<core_parallel>], iteration_bounds = array<i64: 2>, tpu.core_type = #tpu.core_type<sc_scalar_subcore>, window_params = []} {
    return
  }
}

module attributes {stable_mosaic.version = 11 : i64} {
  func.func @_pairlist_kernel(%arg0: i32, %arg1: i32, %arg2: memref<128x3xf32, #tpu.memory_space<vmem>>, %arg3: memref<128x1xi32, #tpu.memory_space<vmem>>, %arg4: memref<3x128xf32, #tpu.memory_space<vmem>>, %arg5: memref<1x128xi32, #tpu.memory_space<vmem>>, %arg6: memref<128x128xf32, #tpu.memory_space<vmem>>) attributes {dimension_semantics = [#tpu.dimension_semantics<parallel>, #tpu.dimension_semantics<parallel>], iteration_bounds = array<i64: 1, 1>, scalar_prefetch = 0 : i64, scratch_operands = 0 : i64, tpu.core_type = #tpu.core_type<tc>, window_params = [{transform_indices = @transform_0, window_bounds = array<i64: 128, 3>}, {transform_indices = @transform_1, window_bounds = array<i64: 128, 1>}, {transform_indices = @transform_2, window_bounds = array<i64: 3, 128>}, {transform_indices = @transform_3, window_bounds = array<i64: 1, 128>}, {transform_indices = @transform_4, window_bounds = array<i64: 128, 128>}]} {
    %c0 = arith.constant 0 : index
    %c0_0 = arith.constant 0 : index
    %0 = vector.load %arg2[%c0, %c0_0] : memref<128x3xf32, #tpu.memory_space<vmem>>, vector<128x1xf32>
    %c0_1 = arith.constant 0 : index
    %c1 = arith.constant 1 : index
    %1 = vector.load %arg2[%c0_1, %c1] : memref<128x3xf32, #tpu.memory_space<vmem>>, vector<128x1xf32>
    %c0_2 = arith.constant 0 : index
    %c2 = arith.constant 2 : index
    %2 = vector.load %arg2[%c0_2, %c2] : memref<128x3xf32, #tpu.memory_space<vmem>>, vector<128x1xf32>
    %c0_3 = arith.constant 0 : index
    %c0_4 = arith.constant 0 : index
    %3 = vector.load %arg4[%c0_3, %c0_4] : memref<3x128xf32, #tpu.memory_space<vmem>>, vector<1x128xf32>
    %c1_5 = arith.constant 1 : index
    %c0_6 = arith.constant 0 : index
    %4 = vector.load %arg4[%c1_5, %c0_6] : memref<3x128xf32, #tpu.memory_space<vmem>>, vector<1x128xf32>
    %c2_7 = arith.constant 2 : index
    %c0_8 = arith.constant 0 : index
    %5 = vector.load %arg4[%c2_7, %c0_8] : memref<3x128xf32, #tpu.memory_space<vmem>>, vector<1x128xf32>
    %6 = vector.broadcast %0 : vector<128x1xf32> to vector<128x128xf32>
    %7 = vector.broadcast %3 : vector<1x128xf32> to vector<128x128xf32>
    %8 = arith.subf %6, %7 : vector<128x128xf32>
    %9 = vector.broadcast %1 : vector<128x1xf32> to vector<128x128xf32>
    %10 = vector.broadcast %4 : vector<1x128xf32> to vector<128x128xf32>
    %11 = arith.subf %9, %10 : vector<128x128xf32>
    %12 = vector.broadcast %2 : vector<128x1xf32> to vector<128x128xf32>
    %13 = vector.broadcast %5 : vector<1x128xf32> to vector<128x128xf32>
    %14 = arith.subf %12, %13 : vector<128x128xf32>
    %15 = arith.mulf %8, %8 : vector<128x128xf32>
    %16 = arith.mulf %11, %11 : vector<128x128xf32>
    %17 = arith.addf %15, %16 : vector<128x128xf32>
    %18 = arith.mulf %14, %14 : vector<128x128xf32>
    %19 = arith.addf %17, %18 : vector<128x128xf32>
    %c0_9 = arith.constant 0 : index
    %c0_10 = arith.constant 0 : index
    %20 = vector.load %arg3[%c0_9, %c0_10] : memref<128x1xi32, #tpu.memory_space<vmem>>, vector<128x1xi32>
    %c0_11 = arith.constant 0 : index
    %c0_12 = arith.constant 0 : index
    %21 = vector.load %arg5[%c0_11, %c0_12] : memref<1x128xi32, #tpu.memory_space<vmem>>, vector<1x128xi32>
    %22 = vector.broadcast %20 : vector<128x1xi32> to vector<128x128xi32>
    %23 = vector.broadcast %21 : vector<1x128xi32> to vector<128x128xi32>
    %24 = arith.cmpi eq, %22, %23 : vector<128x128xi32>
    %c128_i32 = arith.constant 128 : i32
    %25 = arith.muli %arg0, %c128_i32 : i32
    %c128_i32_13 = arith.constant 128 : i32
    %26 = arith.muli %arg1, %c128_i32_13 : i32
    %27 = tpu.iota {dimensions = array<i32: 0>} : vector<128x128xi32>
    %28 = vector.broadcast %25 : i32 to vector<128x128xi32>
    %29 = arith.addi %28, %27 : vector<128x128xi32>
    %30 = tpu.iota {dimensions = array<i32: 1>} : vector<128x128xi32>
    %31 = vector.broadcast %26 : i32 to vector<128x128xi32>
    %32 = arith.addi %31, %30 : vector<128x128xi32>
    %33 = arith.cmpi slt, %29, %32 : vector<128x128xi32>
    %34 = arith.andi %24, %33 : vector<128x128xi1>
    %cst = arith.constant 2.500000e+01 : f32
    %35 = vector.broadcast %cst : f32 to vector<128x128xf32>
    %36 = arith.cmpf olt, %19, %35 : vector<128x128xf32>
    %37 = arith.andi %34, %36 : vector<128x128xi1>
    %38 = math.sqrt %19 : vector<128x128xf32>
    %cst_14 = arith.constant 0x7F800000 : f32
    %39 = vector.broadcast %cst_14 : f32 to vector<128x128xf32>
    %40 = arith.select %37, %38, %39 : vector<128x128xi1>, vector<128x128xf32>
    %c0_15 = arith.constant 0 : index
    %c0_16 = arith.constant 0 : index
    %41 = vector.load %arg6[%c0_15, %c0_16] : memref<128x128xf32, #tpu.memory_space<vmem>>, vector<128x128xf32>
    tpu.vector_store %arg6[%c0_15, %c0_16], %40 {strides = array<i32>} : memref<128x128xf32, #tpu.memory_space<vmem>>, vector<128x128xf32>,
    return
  }
  func.func @transform_0(%arg0: i32, %arg1: i32) -> (i32, i32) {
    %c0_i32 = arith.constant 0 : i32
    %c0_i32_0 = arith.constant 0 : i32
    return %arg0, %c0_i32 : i32, i32
  }
  func.func @transform_1(%arg0: i32, %arg1: i32) -> (i32, i32) {
    %c0_i32 = arith.constant 0 : i32
    %c0_i32_0 = arith.constant 0 : i32
    return %arg0, %c0_i32 : i32, i32
  }
  func.func @transform_2(%arg0: i32, %arg1: i32) -> (i32, i32) {
    %c0_i32 = arith.constant 0 : i32
    %c0_i32_0 = arith.constant 0 : i32
    return %c0_i32, %arg1 : i32, i32
  }
  func.func @transform_3(%arg0: i32, %arg1: i32) -> (i32, i32) {
    %c0_i32 = arith.constant 0 : i32
    %c0_i32_0 = arith.constant 0 : i32
    return %c0_i32, %arg1 : i32, i32
  }
  func.func @transform_4(%arg0: i32, %arg1: i32) -> (i32, i32) {
    %c0_i32 = arith.constant 0 : i32
    return %arg0, %arg1 : i32, i32
  }
}

module attributes {stable_mosaic.version = 11 : i64} {
  func.func @_embedding_gather_kernel(%arg0: i32, %arg1: memref<8xi32, #tpu.memory_space<smem>>, %arg2: memref<1x1x128xf32, #tpu.memory_space<vmem>>, %arg3: memref<1x1x128xf32, #tpu.memory_space<vmem>>) attributes {dimension_semantics = [#tpu.dimension_semantics<parallel>], iteration_bounds = array<i64: 8>, scalar_prefetch = 1 : i64, scratch_operands = 0 : i64, tpu.core_type = #tpu.core_type<tc>, window_params = [{transform_indices = @transform_0, window_bounds = array<i64: 1, 1, 128>}, {transform_indices = @transform_1, window_bounds = array<i64: 1, 1, 128>}]} {
    %c0 = arith.constant 0 : index
    %c0_0 = arith.constant 0 : index
    %c0_1 = arith.constant 0 : index
    %0 = vector.load %arg2[%c0, %c0_0, %c0_1] : memref<1x1x128xf32, #tpu.memory_space<vmem>>, vector<1x1x128xf32>
    %c0_2 = arith.constant 0 : index
    %c0_3 = arith.constant 0 : index
    %c0_4 = arith.constant 0 : index
    %1 = vector.load %arg3[%c0_2, %c0_3, %c0_4] : memref<1x1x128xf32, #tpu.memory_space<vmem>>, vector<1x1x128xf32>
    tpu.vector_store %arg3[%c0_2, %c0_3, %c0_4], %0 {strides = array<i32>} : memref<1x1x128xf32, #tpu.memory_space<vmem>>, vector<1x1x128xf32>,
    return
  }
  func.func @transform_0(%arg0: i32, %arg1: memref<8xi32, #tpu.memory_space<smem>>) -> (i32, i32, i32) {
    %0 = arith.index_cast %arg0 : i32 to index
    %1 = memref.load %arg1[%0] : memref<8xi32, #tpu.memory_space<smem>>
    %c0_i32 = arith.constant 0 : i32
    %c0_i32_0 = arith.constant 0 : i32
    %c0_i32_1 = arith.constant 0 : i32
    return %1, %c0_i32, %c0_i32_0 : i32, i32, i32
  }
  func.func @transform_1(%arg0: i32, %arg1: memref<8xi32, #tpu.memory_space<smem>>) -> (i32, i32, i32) {
    %c0_i32 = arith.constant 0 : i32
    %c0_i32_0 = arith.constant 0 : i32
    %c0_i32_1 = arith.constant 0 : i32
    return %arg0, %c0_i32, %c0_i32_0 : i32, i32, i32
  }
}

</mosaic_0001>

<bundles_post_ra>
// kernel: prepare_inputs.2
= control target key start
LH: loop header
LB: loop body
LE: loop exit
PB: predicated region body
PF: predicated region fallthrough
CT: control target
= control target key end

     0   :  { %v767_v0 = vmov 1   ;;  %v768_v1 = vmov 0   ;;  %v769_v12 = vmov 2   ;;  %s1434_s0 = inlined_call_operand.vmem [shape: f32[128,3], index: 0, kind: input, shape index: {}]   ;;  %s1435_s1 = inlined_call_operand.vmem [shape: s32[128,1], index: 1, kind: input, shape index: {}]   ;;  %s1436_s2 = inlined_call_operand.vmem [shape: f32[3,128], index: 2, kind: input, shape index: {}]   ;;  %s1437_s3 = inlined_call_operand.vmem [shape: s32[1,128], index: 3, kind: input, shape index: {}]   ;;  %s1438_s4 = inlined_call_operand.vmem [shape: f32[128,128], index: 4, kind: output, shape index: {}]  }
   0x1   :  { %729 = vset.pattern.permute.xlu0 %v767_v0  ;;  %728 = vset.pattern.permute.xlu1 %v768_v1  ;;  %v19_v2 = vld [vmem:[%s1434_s0 + $0x10] sm:$0xff]  ;;  %v17_v3 = vld [vmem:[%s1434_s0] sm:$0xff]  ;;  %v20_v4 = vld [vmem:[%s1434_s0 + $0x18] sm:$0xff] }
   0x2   :  { %48 = vperm.xlu1 %728, %v19_v2   ;;  %137 = vperm.xlu0 %729, %v17_v3   ;;  %v22_v5 = vld [vmem:[%s1434_s0 + $0x28] sm:$0xff]  ;;  %v24_v6 = vld [vmem:[%s1434_s0 + $0x38] sm:$0xff]  ;;  %v21_v13 = vld [vmem:[%s1434_s0 + $0x20] sm:$0xff] }
   0x3   :  { %v26_v7 = vld [vmem:[%s1434_s0 + $0x48] sm:$0xff]  ;;  %v28_v8 = vld [vmem:[%s1434_s0 + $0x58] sm:$0xff]  ;;  %v23_v14 = vld [vmem:[%s1434_s0 + $0x30] sm:$0xff] }
   0x4   :  { %v30_v9 = vld [vmem:[%s1434_s0 + $0x68] sm:$0xff]  ;;  %v32_v10 = vld [vmem:[%s1434_s0 + $0x78] sm:$0xff]  ;;  %v25_v15 = vld [vmem:[%s1434_s0 + $0x40] sm:$0xff] }
   0x5   :  { %v18_v11 = vld [vmem:[%s1434_s0 + $0x8] sm:$0xff]  ;;  %v27_v16 = vld [vmem:[%s1434_s0 + $0x50] sm:$0xff]  ;;  %v29_v17 = vld [vmem:[%s1434_s0 + $0x60] sm:$0xff] }
   0x6   :  { %53 = vperm.xlu1 %728, %v20_v4   ;;  %149 = vperm.xlu0 %729, %v20_v4   ;;  %v31_v18 = vld [vmem:[%s1434_s0 + $0x70] sm:$0xff]  ;;  %v384_v19 = vld [vmem:[%s1435_s1] sm:$0xff]  ;;  %v387_v20 = vld [vmem:[%s1435_s1 + $0x18] sm:$0xff] }
   0x7   :  { %v389_v21 = vld [vmem:[%s1435_s1 + $0x28] sm:$0xff]  ;;  %v391_v23 = vld [vmem:[%s1435_s1 + $0x38] sm:$0xff]  ;;  %v386_v24 = vld [vmem:[%s1435_s1 + $0x10] sm:$0xff] }
   0x8   :  { %v385_v22 = vld [vmem:[%s1435_s1 + $0x8] sm:$0xff]  ;;  %v388_v26 = vld [vmem:[%s1435_s1 + $0x20] sm:$0xff]  ;;  %v395_v27 = vld [vmem:[%s1435_s1 + $0x58] sm:$0xff] }
   0x9   :  { %v393_v25 = vld [vmem:[%s1435_s1 + $0x48] sm:$0xff]  ;;  %v390_v28 = vld [vmem:[%s1435_s1 + $0x30] sm:$0xff]  ;;  %v392_v30 = vld [vmem:[%s1435_s1 + $0x40] sm:$0xff] }
   0xa   :  { %63 = vperm.xlu1 %728, %v22_v5   ;;  %157 = vperm.xlu0 %729, %v22_v5   ;;  %v397_v29 = vld [vmem:[%s1435_s1 + $0x68] sm:$0xff]  ;;  %v399_v31 = vld [vmem:[%s1435_s1 + $0x78] sm:$0xff]  ;;  %v394_v32 = vld [vmem:[%s1435_s1 + $0x50] sm:$0xff] }
   0xb   :  { %v396_v33 = vld [vmem:[%s1435_s1 + $0x60] sm:$0xff]  ;;  %v398_v36 = vld [vmem:[%s1435_s1 + $0x70] sm:$0xff] }
   0xc   :  { %v901_v37 = vld [vmem:[%s1436_s2 + $0x1] ss:$0 sm:$0xff]  ;;  %v906_v38 = vld [vmem:[%s1436_s2] ss:$0 sm:$0xff] }
   0xe   :  { %73 = vperm.xlu1 %728, %v24_v6   ;;  %165 = vperm.xlu0 %729, %v24_v6  }
  0x12   :  { %83 = vperm.xlu1 %728, %v26_v7   ;;  %173 = vperm.xlu0 %729, %v26_v7  }
  0x16   :  { %93 = vperm.xlu1 %728, %v28_v8   ;;  %181 = vperm.xlu0 %729, %v28_v8  }
  0x1a   :  { %103 = vperm.xlu1 %728, %v30_v9   ;;  %189 = vperm.xlu0 %729, %v30_v9  }
  0x1e   :  { %113 = vperm.xlu1 %728, %v32_v10   ;;  %197 = vperm.xlu0 %729, %v32_v10  }
  0x22   :  { %730 = vset.pattern.permute.xlu1 %v767_v0  ;;  %732 = vset.pattern.permute.xlu0 %v769_v12 }
  0x23   :  { %141 = vperm.xlu1 %730, %v18_v11   ;;  %225 = vperm.xlu0 %732, %v18_v11  }
  0x27   :  { %145 = vperm.xlu1 %730, %v19_v2   ;;  %237 = vperm.xlu0 %732, %v21_v13  }
  0x2b   :  { %153 = vperm.xlu1 %730, %v21_v13   ;;  %245 = vperm.xlu0 %732, %v23_v14  }
  0x2f   :  { %161 = vperm.xlu1 %730, %v23_v14   ;;  %253 = vperm.xlu0 %732, %v25_v15  }
  0x33   :  { %169 = vperm.xlu1 %730, %v25_v15   ;;  %261 = vperm.xlu0 %732, %v27_v16  }
  0x37   :  { %177 = vperm.xlu1 %730, %v27_v16   ;;  %269 = vperm.xlu0 %732, %v29_v17  }
  0x3b   :  { %185 = vperm.xlu1 %730, %v29_v17   ;;  %277 = vperm.xlu0 %732, %v31_v18  }
  0x3f   :  { %193 = vperm.xlu1 %730, %v31_v18   ;;  %733 = vset.pattern.permute.xlu0 %v768_v1 }
  0x40   :  { %38 = vperm.xlu0 %733, %v17_v3  }
  0x43   :  { %731 = vset.pattern.permute.xlu1 %v769_v12 }
  0x44   :  { %221 = vperm.xlu1 %731, %v17_v3   ;;  %43 = vperm.xlu0 %733, %v18_v11  }
  0x48   :  { %229 = vperm.xlu1 %731, %v19_v2   ;;  %58 = vperm.xlu0 %733, %v21_v13  }
  0x4c   :  { %233 = vperm.xlu1 %731, %v20_v4   ;;  %68 = vperm.xlu0 %733, %v23_v14  }
  0x50   :  { %241 = vperm.xlu1 %731, %v22_v5   ;;  %78 = vperm.xlu0 %733, %v25_v15  }
  0x54   :  { %249 = vperm.xlu1 %731, %v24_v6   ;;  %88 = vperm.xlu0 %733, %v27_v16  }
  0x58   :  { %257 = vperm.xlu1 %731, %v26_v7   ;;  %98 = vperm.xlu0 %733, %v29_v17  }
  0x5c   :  { %265 = vperm.xlu1 %731, %v28_v8   ;;  %108 = vperm.xlu0 %733, %v31_v18  }
  0x60   :  { %273 = vperm.xlu1 %731, %v30_v9   ;;  %402 = vperm.xlu0 %733, %v384_v19  }
  0x64   :  { %281 = vperm.xlu1 %731, %v32_v10   ;;  %411 = vperm.xlu0 %733, %v387_v20  }
  0x68   :  { %734 = vset.pattern.permute.xlu1 %v768_v1  ;;  %417 = vperm.xlu0 %733, %v389_v21  }
  0x69   :  { %405 = vperm.xlu1 %734, %v385_v22  }
  0x6c   :  { %423 = vperm.xlu0 %733, %v391_v23  }
  0x6d   :  { %408 = vperm.xlu1 %734, %v386_v24  }
  0x70   :  { %429 = vperm.xlu0 %733, %v393_v25  }
  0x71   :  { %414 = vperm.xlu1 %734, %v388_v26  }
  0x74   :  { %435 = vperm.xlu0 %733, %v395_v27  }
  0x75   :  { %420 = vperm.xlu1 %734, %v390_v28  }
  0x78   :  { %441 = vperm.xlu0 %733, %v397_v29  }
  0x79   :  { %426 = vperm.xlu1 %734, %v392_v30  }
  0x7c   :  { %447 = vperm.xlu0 %733, %v399_v31  }
  0x7d   :  { %432 = vperm.xlu1 %734, %v394_v32  }
  0x81   :  { %v891_v34 = vpop.permute.xlu1 %48  ;;  %438 = vperm.xlu1 %734, %v396_v33   ;;  %v893_v35 = vpop.permute.xlu0 %137 }
  0x85   :  { %v54_v39 = vpop.permute.xlu1 %53  ;;  %444 = vperm.xlu1 %734, %v398_v36   ;;  %v150_v40 = vpop.permute.xlu0 %149 }
  0x86   :  { %v123_v41 = vsub.f32 %v54_v39, %v906_v38  ;;  %v207_v42 = vsub.f32 %v150_v40, %v901_v37 }
  0x88   :  { %v307_v43 = vmul.f32 %v123_v41, %v123_v41  ;;  %v323_v44 = vmul.f32 %v207_v42, %v207_v42 }
  0x89   :  { %v64_v45 = vpop.permute.xlu1 %63  ;;  %v158_v46 = vpop.permute.xlu0 %157 }
  0x8a   :  { %v910_v47 = vadd.f32 %v323_v44, %v307_v43  ;;  %v125_v48 = vsub.f32 %v64_v45, %v906_v38  ;;  %v209_v49 = vsub.f32 %v158_v46, %v901_v37  ;;  %v471_v44 = vlaneseq }
  0x8b   :  { %v204_v46 = vsub.f32 %v893_v35, %v901_v37 }
  0x8c   :  { %v309_v50 = vmul.f32 %v125_v48, %v125_v48  ;;  %v325_v51 = vmul.f32 %v209_v49, %v209_v49  ;;  %v958_v48 = vld [vmem:[%s1436_s2 + $0x2] ss:$0 sm:$0xff] }
  0x8d   :  { %v74_v52 = vpop.permute.xlu1 %73  ;;  %v166_v53 = vpop.permute.xlu0 %165 }
  0x8e   :  { %v914_v54 = vadd.f32 %v325_v51, %v309_v50  ;;  %v127_v55 = vsub.f32 %v74_v52, %v906_v38  ;;  %v211_v56 = vsub.f32 %v166_v53, %v901_v37  ;;  %v960_v51 = vshrl.u32 %v471_v44, 7 }
  0x90   :  { %v311_v57 = vmul.f32 %v127_v55, %v127_v55  ;;  %v327_v58 = vmul.f32 %v211_v56, %v211_v56  ;;  %v964_v56 = vand.u32 127, %v471_v44  ;;  %v970_v35 = vadd.s32 40, %v960_v51 }
  0x91   :  { %v84_v59 = vpop.permute.xlu1 %83  ;;  %v174_v60 = vpop.permute.xlu0 %173 }
  0x92   :  { %v918_v61 = vadd.f32 %v327_v58, %v311_v57  ;;  %v129_v62 = vsub.f32 %v84_v59, %v906_v38  ;;  %v213_v63 = vsub.f32 %v174_v60, %v901_v37  ;;  %v967_v57 = vadd.s32 24, %v960_v51 }
  0x93   :  { %v973_v58 = vadd.s32 8, %v960_v51  ;;  %v320_v59 = vmul.f32 %v204_v46, %v204_v46  ;;  %vm509_vm0 = vcmp.lt.s32.totalorder %v960_v51, %v964_v56 }
  0x94   :  { %v313_v0 = vmul.f32 %v129_v62, %v129_v62  ;;  %v329_v1 = vmul.f32 %v213_v63, %v213_v63  ;;  %v977_v63 = vadd.s32 56, %v960_v51  ;;  %vm512_vm4 = vcmp.lt.s32.totalorder %v967_v57, %v964_v56 }
  0x95   :  { %v94_v2 = vpop.permute.xlu1 %93  ;;  %v182_v3 = vpop.permute.xlu0 %181 }
  0x96   :  { %v922_v4 = vadd.f32 %v329_v1, %v313_v0  ;;  %v131_v5 = vsub.f32 %v94_v2, %v906_v38  ;;  %v215_v6 = vsub.f32 %v182_v3, %v901_v37  ;;  %v981_v3 = vadd.s32 16, %v960_v51 }
  0x98   :  { %v315_v7 = vmul.f32 %v131_v5, %v131_v5  ;;  %v331_v8 = vmul.f32 %v215_v6, %v215_v6  ;;  %v984_v5 = vadd.s32 72, %v960_v51  ;;  %v987_v6 = vadd.s32 32, %v960_v51 }
  0x99   :  { %v104_v9 = vpop.permute.xlu1 %103  ;;  %v190_v10 = vpop.permute.xlu0 %189 }
  0x9a   :  { %v926_v11 = vadd.f32 %v331_v8, %v315_v7  ;;  %v133_v12 = vsub.f32 %v104_v9, %v906_v38  ;;  %v217_v13 = vsub.f32 %v190_v10, %v901_v37  ;;  %v990_v9 = vadd.s32 88, %v960_v51 }
  0x9b   :  { %v993_v10 = vadd.s32 48, %v960_v51 }
  0x9c   :  { %v317_v14 = vmul.f32 %v133_v12, %v133_v12  ;;  %v333_v15 = vmul.f32 %v217_v13, %v217_v13  ;;  %v122_v12 = vsub.f32 %v891_v34, %v906_v38 }
  0x9d   :  { %v114_v16 = vpop.permute.xlu1 %113  ;;  %v198_v17 = vpop.permute.xlu0 %197 }
  0x9e   :  { %v930_v18 = vadd.f32 %v333_v15, %v317_v14  ;;  %v135_v19 = vsub.f32 %v114_v16, %v906_v38  ;;  %v219_v20 = vsub.f32 %v198_v17, %v901_v37  ;;  %v999_v14 = vadd.s32 104, %v960_v51 }
  0x9f   :  { %v1002_v15 = vadd.s32 64, %v960_v51  ;;  %v306_v46 = vmul.f32 %v122_v12, %v122_v12 }
  0xa0   :  { %v319_v21 = vmul.f32 %v135_v19, %v135_v19  ;;  %v335_v22 = vmul.f32 %v219_v20, %v219_v20  ;;  %v1008_v20 = vadd.s32 120, %v960_v51 }
  0xa2   :  { %v934_v23 = vadd.f32 %v335_v22, %v319_v21  ;;  %v142_v24 = vpop.permute.xlu1 %141  ;;  %v226_v25 = vpop.permute.xlu0 %225 }
  0xa3   :  { %v205_v60 = vsub.f32 %v142_v24, %v901_v37  ;;  %v289_v13 = vsub.f32 %v226_v25, %v958_v48 }
  0xa5   :  { %v321_v16 = vmul.f32 %v205_v60, %v205_v60 }
  0xa6   :  { %v146_v26 = vpop.permute.xlu1 %145  ;;  %v238_v27 = vpop.permute.xlu0 %237 }
  0xa7   :  { %v206_v0 = vsub.f32 %v146_v26, %v901_v37  ;;  %v292_v17 = vsub.f32 %v238_v27, %v958_v48  ;;  %v1013_v26 = vadd.s32 80, %v960_v51 }
  0xa9   :  { %v322_v21 = vmul.f32 %v206_v0, %v206_v0 }
  0xaa   :  { %v154_v28 = vpop.permute.xlu1 %153  ;;  %v246_v29 = vpop.permute.xlu0 %245 }
  0xab   :  { %v208_v22 = vsub.f32 %v154_v28, %v901_v37  ;;  %v294_v34 = vsub.f32 %v246_v29, %v958_v48  ;;  %v356_v29 = vmul.f32 %v292_v17, %v292_v17 }
  0xad   :  { %v358_v60 = vmul.f32 %v294_v34, %v294_v34 }
  0xae   :  { %v162_v30 = vpop.permute.xlu1 %161  ;;  %v936_v31 = vpop.permute.xlu0 %253 }
  0xb2   :  { %v938_v32 = vpop.permute.xlu1 %169  ;;  %v940_v33 = vpop.permute.xlu0 %261 }
  0xb6   :  { %v942_v36 = vpop.permute.xlu1 %177  ;;  %v944_v39 = vpop.permute.xlu0 %269 }
  0xba   :  { %v946_v40 = vpop.permute.xlu1 %185  ;;  %v948_v41 = vpop.permute.xlu0 %277 }
  0xbe   :  { %v950_v42 = vpop.permute.xlu1 %193 }
  0xbf   :  { %v39_v43 = vpop.permute.xlu0 %38 }
  0xc0   :  { %v120_v45 = vsub.f32 %v39_v43, %v906_v38 }
  0xc2   :  { %v304_v52 = vmul.f32 %v120_v45, %v120_v45  ;;  %v1018_v45 = vadd.s32 96, %v960_v51 }
  0xc3   :  { %v222_v49 = vpop.permute.xlu1 %221  ;;  %v44_v50 = vpop.permute.xlu0 %43 }
  0xc4   :  { %v288_v53 = vsub.f32 %v222_v49, %v958_v48  ;;  %v121_v55 = vsub.f32 %v44_v50, %v906_v38  ;;  %v336_v7 = vadd.f32 %v320_v59, %v304_v52  ;;  %v353_v49 = vmul.f32 %v289_v13, %v289_v13 }
  0xc5   :  { %v210_v50 = vsub.f32 %v162_v30, %v901_v37  ;;  %v324_v59 = vmul.f32 %v208_v22, %v208_v22  ;;  %v212_v13 = vsub.f32 %v938_v32, %v901_v37  ;;  %v218_v32 = vsub.f32 %v950_v42, %v901_v37 }
  0xc6   :  { %v352_v62 = vmul.f32 %v288_v53, %v288_v53  ;;  %v305_v8 = vmul.f32 %v121_v55, %v121_v55  ;;  %v338_v55 = vadd.f32 %v322_v21, %v306_v46  ;;  %v300_v21 = vsub.f32 %v944_v39, %v958_v48 }
  0xc7   :  { %v230_v1 = vpop.permute.xlu1 %229  ;;  %v59_v2 = vpop.permute.xlu0 %58  ;;  %v326_v12 = vmul.f32 %v210_v50, %v210_v50 }
  0xc8   :  { %v1005_v19 = vadd.f32 %v352_v62, %v336_v7  ;;  %v337_v43 = vadd.f32 %v321_v16, %v305_v8  ;;  %v124_v44 = vsub.f32 %v59_v2, %v906_v38  ;;  %v290_v28 = vsub.f32 %v230_v1, %v958_v48 }
  0xc9   :  { %v296_v62 = vsub.f32 %v936_v31, %v958_v48  ;;  %v298_v16 = vsub.f32 %v940_v33, %v958_v48  ;;  %v214_v31 = vsub.f32 %v942_v36, %v901_v37 }
  0xca   :  { %735 = vrsqrt.f32 %v1005_v19  ;;  %v1026_v7 = vadd.f32 %v353_v49, %v337_v43  ;;  %v308_v8 = vmul.f32 %v124_v44, %v124_v44  ;;  %v354_v17 = vmul.f32 %v290_v28, %v290_v28 }
  0xcb   :  { %v234_v24 = vpop.permute.xlu1 %233  ;;  %v69_v25 = vpop.permute.xlu0 %68  ;;  %v1052_v44 = vmul.f32 %v296_v62, %v296_v62  ;;  %v330_v42 = vmul.f32 %v214_v31, %v214_v31  ;;  %vm541_vm1 = vcmp.lt.f32.partialorder %v1005_v19, 25.0  ;;  %vm575_vm2 = vcmp.eq.f32.partialorder %v1005_v19, inf }
  0xcc   :  { %v291_v27 = vsub.f32 %v234_v24, %v958_v48  ;;  %v126_v53 = vsub.f32 %v69_v25, %v906_v38  ;;  %v302_v24 = vsub.f32 %v948_v41, %v958_v48  ;;  %v340_v43 = vadd.f32 %v324_v59, %v308_v8 }
  0xcd   :  { %v1068_v59 = vmul.f32 %v218_v32, %v218_v32  ;;  %vm577_vm3 = vcmp.eq.f32.partialorder %v1005_v19, 0.0  ;;  %v585_v31 = vand.u32 2147483648, %v1026_v7  ;;  %vm582_vm5 = vcmp.eq.f32.partialorder %v1026_v7, inf  ;;  %v1099_v32 = vld [vmem:[%s1437_s3] ss:$0 sm:$0xff] }
  0xce   :  { %v355_v52 = vmul.f32 %v291_v27, %v291_v27  ;;  %v310_v22 = vmul.f32 %v126_v53, %v126_v53  ;;  %v1054_v27 = vadd.f32 %v354_v17, %v338_v55  ;;  %v1065_v28 = vmul.f32 %v302_v24, %v302_v24 }
  0xcf   :  { %v242_v0 = vpop.permute.xlu1 %241  ;;  %v79_v2 = vpop.permute.xlu0 %78  ;;  %v1070_v62 = vadd.f32 %v356_v29, %v340_v43  ;;  %v578_v17 = vand.u32 2147483648, %v1005_v19  ;;  %vm584_vm10 = vcmp.eq.f32.partialorder %v1026_v7, 0.0 }
  0xd0   :  { %v1029_v30 = vadd.f32 %v355_v52, %v910_v47  ;;  %v293_v1 = vsub.f32 %v242_v0, %v958_v48  ;;  %v216_v47 = vsub.f32 %v946_v40, %v901_v37  ;;  %v328_v40 = vmul.f32 %v212_v13, %v212_v13 }
  0xd1   :  { %v128_v41 = vsub.f32 %v79_v2, %v906_v38  ;;  %v1057_v37 = vmul.f32 %v298_v16, %v298_v16  ;;  %v342_v46 = vadd.f32 %v326_v12, %v310_v22  ;;  %v592_v22 = vand.u32 2147483648, %v1054_v27 }
  0xd2   :  { %v357_v34 = vmul.f32 %v293_v1, %v293_v1  ;;  %737 = vrsqrt.f32 %v1029_v30  ;;  %v1063_v50 = vmul.f32 %v216_v47, %v216_v47  ;;  %vm544_vm6 = vcmp.lt.f32.partialorder %v1029_v30, 25.0 }
  0xd3   :  { %v250_v25 = vpop.permute.xlu1 %249  ;;  %v89_v33 = vpop.permute.xlu0 %88  ;;  %739 = vrsqrt.f32 %v1026_v7  ;;  %v312_v8 = vmul.f32 %v128_v41, %v128_v41  ;;  %v1079_v12 = vadd.f32 %v358_v60, %v342_v46  ;;  %vm596_vm7 = vcmp.eq.f32.partialorder %v1029_v30, inf }
  0xd4   :  { %v1048_v36 = vadd.f32 %v357_v34, %v914_v54  ;;  %v295_v39 = vsub.f32 %v250_v25, %v958_v48  ;;  %v1061_v54 = vmul.f32 %v300_v21, %v300_v21  ;;  %v736_v55 = vpop.eup %735  ;;  %v130_v1 = vsub.f32 %v89_v33, %v906_v38 }
  0xd5   :  { %v574_v16 = vmul.f32 %v736_v55, %v1005_v19  ;;  %v344_v47 = vadd.f32 %v328_v40, %v312_v8  ;;  %vm598_vm8 = vcmp.eq.f32.partialorder %v1029_v30, 0.0  ;;  %v599_v33 = vand.u32 2147483648, %v1029_v30 }
  0xd6   :  { %v359_v49 = vmul.f32 %v295_v39, %v295_v39  ;;  %741 = vrsqrt.f32 %v1048_v36  ;;  %v314_v24 = vmul.f32 %v130_v1, %v130_v1  ;;  %v606_v46 = vand.u32 2147483648, %v1070_v62 }
  0xd7   :  { %v258_v52 = vpop.permute.xlu1 %257  ;;  %v99_v53 = vpop.permute.xlu0 %98  ;;  %743 = vrsqrt.f32 %v1054_v27  ;;  %v576_v39 = vsel %vm575_vm2, %v1005_v19, %v574_v16  ;;  %v1124_v8 = vadd.f32 %v1052_v44, %v344_v47  ;;  %vm546_vm14 = vcmp.lt.f32.partialorder %v1048_v36, 25.0 }
  0xd8   :  { %v1073_v0 = vadd.f32 %v359_v49, %v918_v61  ;;  %v297_v2 = vsub.f32 %v258_v52, %v958_v48  ;;  %v132_v49 = vsub.f32 %v99_v53, %v906_v38  ;;  %v346_v1 = vadd.f32 %v330_v42, %v314_v24 }
  0xd9   :  { %vm589_vm15 = vcmp.eq.f32.partialorder %v1054_v27, inf  ;;  %vm610_vm12 = vcmp.eq.f32.partialorder %v1048_v36, inf  ;;  %vm612_vm9 = vcmp.eq.f32.partialorder %v1048_v36, 0.0 }
  0xda   :  { %v361_v13 = vmul.f32 %v297_v2, %v297_v2  ;;  %745 = vrsqrt.f32 %v1073_v0  ;;  %v316_v19 = vmul.f32 %v132_v49, %v132_v49 }
  0xdb   :  { %v266_v61 = vpop.permute.xlu1 %265  ;;  %v109_v29 = vpop.permute.xlu0 %108  ;;  %747 = vrsqrt.f32 %v1070_v62 }
  0xdc   :  { %v1090_v60 = vadd.f32 %v361_v13, %v922_v4  ;;  %v299_v21 = vsub.f32 %v266_v61, %v958_v48  ;;  %v738_v34 = vpop.eup %737  ;;  %749 = vrsqrt.f32 %v1079_v12  ;;  %v579_v13 = vsel %vm577_vm3, %v578_v17, %v576_v39 }
  0xdd   :  { %v740_v4 = vpop.eup %739  ;;  %v595_v41 = vmul.f32 %v738_v34, %v1029_v30  ;;  %vm542_vm3 = vcmp.lt.f32.partialorder %v1026_v7, 25.0  ;;  %v134_v34 = vsub.f32 %v109_v29, %v906_v38  ;;  %v613_v38 = vand.u32 2147483648, %v1048_v36 }
  0xde   :  { %v363_v25 = vmul.f32 %v299_v21, %v299_v21  ;;  %751 = vrsqrt.f32 %v1090_v60 }
  0xdf   :  { %v274_v43 = vpop.permute.xlu1 %273  ;;  %v403_v40 = vpop.permute.xlu0 %402  ;;  %v597_v16 = vsel %vm596_vm7, %v1029_v30, %v595_v41  ;;  %v318_v49 = vmul.f32 %v134_v34, %v134_v34 }
  0xe0   :  { %v1117_v52 = vadd.f32 %v363_v25, %v926_v11  ;;  %v301_v55 = vsub.f32 %v274_v43, %v958_v48  ;;  %vm453_vm11 = vcmp.eq.s32.totalorder %v403_v40, %v1099_v32  ;;  %v742_v2 = vpop.eup %741  ;;  %v581_v11 = vmul.f32 %v740_v4, %v1026_v7 }
  0xe1   :  { %vm525_vm13 = vmand %vm453_vm11, %vm509_vm0  ;;  %vm516_vm0 = vcmp.lt.s32.totalorder %v977_v63, %v964_v56  ;;  %v744_v44 = vpop.eup %743  ;;  %v609_v17 = vmul.f32 %v742_v2, %v1048_v36  ;;  %v1156_v4 = vadd.f32 %v1057_v37, %v346_v1  ;;  %v600_v37 = vsel %vm598_vm8, %v599_v33, %v597_v16 }
  0xe2   :  { %v365_v53 = vmul.f32 %v301_v55, %v301_v55  ;;  %vm557_vm2 = vmand %vm525_vm13, %vm541_vm1  ;;  %753 = vrsqrt.f32 %v1117_v52  ;;  %vm548_vm11 = vcmp.lt.f32.partialorder %v1073_v0, 25.0  ;;  %v348_v33 = vadd.f32 %v1063_v50, %v316_v19 }
  0xe3   :  { %v685_v42 = vsel %vm557_vm2, %v579_v13, inf  ;;  %v282_v61 = vpop.permute.xlu1 %281  ;;  %v412_v21 = vpop.permute.xlu0 %411  ;;  %vm603_vm2 = vcmp.eq.f32.partialorder %v1070_v62, inf  ;;  %v611_v39 = vsel %vm610_vm12, %v1048_v36, %v609_v17  ;;  %v627_v50 = vand.u32 2147483648, %v1073_v0 }
  0xe4   :  { %701 = vst [vmem:[%s1438_s4] sm:$0xff] %v685_v42  ;;  %v303_v47 = vsub.f32 %v282_v61, %v958_v48  ;;  %vm456_vm1 = vcmp.eq.s32.totalorder %v412_v21, %v1099_v32  ;;  %v746_v24 = vpop.eup %745  ;;  %v1159_v25 = vadd.f32 %v365_v53, %v930_v18  ;;  %v583_v48 = vsel %vm582_vm5, %v1026_v7, %v581_v11 }
  0xe5   :  { %vm528_vm13 = vmand %vm456_vm1, %vm512_vm4  ;;  %v748_v29 = vpop.eup %747  ;;  %v588_v18 = vmul.f32 %v744_v44, %v1054_v27  ;;  %v623_v41 = vmul.f32 %v746_v24, %v1073_v0  ;;  %vm624_vm5 = vcmp.eq.f32.partialorder %v1073_v0, inf  ;;  %v586_v2 = vsel %vm584_vm10, %v585_v31, %v583_v48 }
  0xe6   :  { %v367_v43 = vmul.f32 %v303_v47, %v303_v47  ;;  %vm560_vm7 = vmand %vm528_vm13, %vm544_vm6  ;;  %v750_v30 = vpop.eup %749  ;;  %vm1439_vm1 = vcmp.lt.s32.totalorder %v970_v35, %v964_v56  ;;  %vm626_vm4 = vcmp.eq.f32.partialorder %v1073_v0, 0.0  ;;  %755 = vrsqrt.f32 %v1159_v25 }
  0xe7   :  { %v688_v57 = vsel %vm560_vm7, %v600_v37, inf  ;;  %v418_v40 = vpop.permute.xlu0 %417  ;;  %v614_v11 = vsel %vm612_vm9, %v613_v38, %v611_v39  ;;  %v590_v35 = vsel %vm589_vm15, %v1054_v27, %v588_v18  ;;  %v602_v53 = vmul.f32 %v748_v29, %v1070_v62 }
  0xe8   :  { %704 = vst [vmem:[%s1438_s4 + $0x18] sm:$0xff] %v688_v57  ;;  %vm458_vm6 = vcmp.eq.s32.totalorder %v418_v40, %v1099_v32  ;;  %v406_v55 = vpop.permute.xlu1 %405  ;;  %v752_v1 = vpop.eup %751  ;;  %v1203_v31 = vadd.f32 %v367_v43, %v934_v23  ;;  %vm1440_vm12 = vcmp.lt.s32.totalorder %v973_v58, %v964_v56  ;;  %v625_v23 = vsel %vm624_vm5, %v1073_v0, %v623_v41 }
  0xe9   :  { %vm530_vm7 = vmand %vm458_vm6, %vm1439_vm1  ;;  %vm454_vm13 = vcmp.eq.s32.totalorder %v406_v55, %v1099_v32  ;;  %vm520_vm6 = vcmp.lt.s32.totalorder %v990_v9, %v964_v56  ;;  %vm617_vm1 = vcmp.eq.f32.partialorder %v1079_v12, inf  ;;  %v637_v44 = vmul.f32 %v752_v1, %v1090_v60 }
  0xea   :  { %vm562_vm10 = vmand %vm530_vm7, %vm546_vm14  ;;  %vm545_vm9 = vcmp.lt.f32.partialorder %v1070_v62, 25.0  ;;  %757 = vrsqrt.f32 %v1124_v8  ;;  %v1226_v42 = vadd.f32 %v1061_v54, %v348_v33  ;;  %v350_v61 = vadd.f32 %v1068_v59, %v318_v49 }
  0xeb   :  { %v690_v13 = vsel %vm562_vm10, %v614_v11, inf  ;;  %vm526_vm8 = vmand %vm454_vm13, %vm1440_vm12  ;;  %v424_v36 = vpop.permute.xlu0 %423  ;;  %vm550_vm5 = vcmp.lt.f32.partialorder %v1090_v60, 25.0  ;;  %vm515_vm12 = vcmp.lt.s32.totalorder %v993_v10, %v964_v56  ;;  %vm1441_vm13 = vcmp.eq.f32.partialorder %v1054_v27, 0.0 }
  0xec   :  { %706 = vst [vmem:[%s1438_s4 + $0x28] sm:$0xff] %v690_v13  ;;  %vm558_vm14 = vmand %vm526_vm8, %vm542_vm3  ;;  %vm460_vm15 = vcmp.eq.s32.totalorder %v424_v36, %v1099_v32  ;;  %v409_v58 = vpop.permute.xlu1 %408  ;;  %v754_v16 = vpop.eup %753  ;;  %v593_v7 = vsel %vm1441_vm13, %v592_v22, %v590_v35  ;;  %vm638_vm8 = vcmp.eq.f32.partialorder %v1090_v60, inf  ;;  %v628_v59 = vsel %vm626_vm4, %v627_v50, %v625_v23 }
  0xed   :  { %v686_v54 = vsel %vm558_vm14, %v586_v2, inf  ;;  %vm532_vm7 = vmand %vm460_vm15, %vm516_vm0  ;;  %vm455_vm3 = vcmp.eq.s32.totalorder %v409_v58, %v1099_v32  ;;  %vm640_vm0 = vcmp.eq.f32.partialorder %v1090_v60, 0.0  ;;  %v604_v63 = vsel %vm603_vm2, %v1070_v62, %v602_v53 }
  0xee   :  { %702 = vst [vmem:[%s1438_s4 + $0x8] sm:$0xff] %v686_v54  ;;  %vm564_vm10 = vmand %vm532_vm7, %vm548_vm11  ;;  %759 = vrsqrt.f32 %v1203_v31  ;;  %vm1442_vm15 = vcmp.lt.s32.totalorder %v981_v3, %v964_v56  ;;  %v639_v21 = vsel %vm638_vm8, %v1090_v60, %v637_v44  ;;  %v651_v17 = vmul.f32 %v754_v16, %v1117_v52 }
  0xef   :  { %v692_v22 = vsel %vm564_vm10, %v628_v59, inf  ;;  %vm527_vm13 = vmand %vm455_vm3, %vm1442_vm15  ;;  %v430_v0 = vpop.permute.xlu0 %429  ;;  %vm547_vm11 = vcmp.lt.f32.partialorder %v1079_v12, 25.0  ;;  %v616_v19 = vmul.f32 %v750_v30, %v1079_v12  ;;  %v1269_v34 = vadd.f32 %v1065_v28, %v350_v61 }
  0xf0   :  { %708 = vst [vmem:[%s1438_s4 + $0x38] sm:$0xff] %v692_v22  ;;  %vm1443_vm2 = vcmp.lt.f32.partialorder %v1054_v27, 25.0  ;;  %v641_v3 = vand.u32 2147483648, %v1090_v60  ;;  %vm462_vm7 = vcmp.eq.s32.totalorder %v430_v0, %v1099_v32  ;;  %v415_v47 = vpop.permute.xlu1 %414  ;;  %761 = vrsqrt.f32 %v1156_v4  ;;  %v756_v28 = vpop.eup %755 }
  0xf1   :  { %vm559_vm4 = vmand %vm527_vm13, %vm1443_vm2  ;;  %vm1444_vm8 = vcmp.lt.s32.totalorder %v984_v5, %v964_v56  ;;  %vm457_vm15 = vcmp.eq.s32.totalorder %v415_v47, %v1099_v32  ;;  %vm552_vm14 = vcmp.lt.f32.partialorder %v1117_v52, 25.0  ;;  %vm652_vm13 = vcmp.eq.f32.partialorder %v1117_v52, inf }
  0xf2   :  { %v687_v24 = vsel %vm559_vm4, %v593_v7, inf  ;;  %vm534_vm10 = vmand %vm462_vm7, %vm1444_vm8  ;;  %v642_v27 = vsel %vm640_vm0, %v641_v3, %v639_v21  ;;  %vm1445_vm4 = vcmp.eq.f32.partialorder %v1070_v62, 0.0  ;;  %vm654_vm7 = vcmp.eq.f32.partialorder %v1117_v52, 0.0 }
  0xf3   :  { %703 = vst [vmem:[%s1438_s4 + $0x10] sm:$0xff] %v687_v24  ;;  %vm566_vm2 = vmand %vm534_vm10, %vm550_vm5  ;;  %v607_v5 = vsel %vm1445_vm4, %v606_v46, %v604_v63  ;;  %vm524_vm8 = vcmp.lt.s32.totalorder %v1008_v20, %v964_v56  ;;  %763 = vrsqrt.f32 %v1226_v42  ;;  %vm1446_vm0 = vcmp.lt.s32.totalorder %v987_v6, %v964_v56  ;;  %v436_v29 = vpop.permute.xlu0 %435 }
  0xf4   :  { %v694_v38 = vsel %vm566_vm2, %v642_v27, inf  ;;  %vm529_vm3 = vmand %vm457_vm15, %vm1446_vm0  ;;  %v653_v60 = vsel %vm652_vm13, %v1117_v52, %v651_v17  ;;  %v655_v48 = vand.u32 2147483648, %v1117_v52  ;;  %v618_v46 = vsel %vm617_vm1, %v1079_v12, %v616_v19  ;;  %v421_v6 = vpop.permute.xlu1 %420  ;;  %v758_v18 = vpop.eup %757 }
  0xf5   :  { %710 = vst [vmem:[%s1438_s4 + $0x48] sm:$0xff] %v694_v38  ;;  %vm561_vm5 = vmand %vm529_vm3, %vm545_vm9  ;;  %vm464_vm10 = vcmp.eq.s32.totalorder %v436_v29, %v1099_v32  ;;  %v620_v43 = vand.u32 2147483648, %v1079_v12  ;;  %v665_v37 = vmul.f32 %v756_v28, %v1159_v25  ;;  %vm519_vm15 = vcmp.lt.s32.totalorder %v1013_v26, %v964_v56 }
  0xf6   :  { %765 = vrsqrt.f32 %v1269_v34  ;;  %v689_v57 = vsel %vm561_vm5, %v607_v5, inf  ;;  %vm536_vm1 = vmand %vm464_vm10, %vm520_vm6  ;;  %vm459_vm9 = vcmp.eq.s32.totalorder %v421_v6, %v1099_v32  ;;  %vm619_vm3 = vcmp.eq.f32.partialorder %v1079_v12, 0.0 }
  0xf7   :  { %vm554_vm13 = vcmp.lt.f32.partialorder %v1159_v25, 25.0  ;;  %705 = vst [vmem:[%s1438_s4 + $0x20] sm:$0xff] %v689_v57  ;;  %v656_v62 = vsel %vm654_vm7, %v655_v48, %v653_v60  ;;  %vm568_vm2 = vmand %vm536_vm1, %vm552_vm14  ;;  %v621_v39 = vsel %vm619_vm3, %v620_v43, %v618_v46  ;;  %vm666_vm4 = vcmp.eq.f32.partialorder %v1159_v25, inf  ;;  %v442_v33 = vpop.permute.xlu0 %441 }
  0xf8   :  { %v630_v9 = vmul.f32 %v758_v18, %v1124_v8  ;;  %v696_v40 = vsel %vm568_vm2, %v656_v62, inf  ;;  %vm531_vm6 = vmand %vm459_vm9, %vm515_vm12  ;;  %v667_v41 = vsel %vm666_vm4, %v1159_v25, %v665_v37  ;;  %vm668_vm0 = vcmp.eq.f32.partialorder %v1159_v25, 0.0  ;;  %v760_v49 = vpop.eup %759  ;;  %v427_v52 = vpop.permute.xlu1 %426 }
  0xf9   :  { %v669_v30 = vand.u32 2147483648, %v1159_v25  ;;  %712 = vst [vmem:[%s1438_s4 + $0x58] sm:$0xff] %v696_v40  ;;  %vm563_vm14 = vmand %vm531_vm6, %vm547_vm11  ;;  %vm466_vm7 = vcmp.eq.s32.totalorder %v442_v33, %v1099_v32  ;;  %vm549_vm12 = vcmp.lt.f32.partialorder %v1124_v8, 25.0  ;;  %vm631_vm5 = vcmp.eq.f32.partialorder %v1124_v8, inf }
  0xfa   :  { %vm633_vm10 = vcmp.eq.f32.partialorder %v1124_v8, 0.0  ;;  %v691_v10 = vsel %vm563_vm14, %v621_v39, inf  ;;  %vm1447_vm1 = vcmp.lt.s32.totalorder %v999_v14, %v964_v56  ;;  %vm461_vm3 = vcmp.eq.s32.totalorder %v427_v52, %v1099_v32  ;;  %v762_v2 = vpop.eup %761 }
  0xfb   :  { %vm538_vm9 = vmand %vm466_vm7, %vm1447_vm1  ;;  %v632_v55 = vsel %vm631_vm5, %v1124_v8, %v630_v9  ;;  %v679_v12 = vmul.f32 %v760_v49, %v1203_v31  ;;  %707 = vst [vmem:[%s1438_s4 + $0x30] sm:$0xff] %v691_v10  ;;  %v670_v1 = vsel %vm668_vm0, %v669_v30, %v667_v41  ;;  %v634_v14 = vand.u32 2147483648, %v1124_v8  ;;  %v448_v35 = vpop.permute.xlu0 %447 }
  0xfc   :  { %vm570_vm11 = vmand %vm538_vm9, %vm554_vm13  ;;  %vm556_vm2 = vcmp.lt.f32.partialorder %v1203_v31, 25.0  ;;  %vm680_vm4 = vcmp.eq.f32.partialorder %v1203_v31, inf  ;;  %vm1448_vm6 = vcmp.lt.s32.totalorder %v1002_v15, %v964_v56  ;;  %vm682_vm7 = vcmp.eq.f32.partialorder %v1203_v31, 0.0  ;;  %v433_v23 = vpop.permute.xlu1 %432 }
  0xfd   :  { %v698_v50 = vsel %vm570_vm11, %v670_v1, inf  ;;  %vm533_vm14 = vmand %vm461_vm3, %vm1448_vm6  ;;  %v681_v11 = vsel %vm680_vm4, %v1203_v31, %v679_v12  ;;  %v644_v53 = vmul.f32 %v762_v2, %v1156_v4  ;;  %v764_v25 = vpop.eup %763  ;;  %v635_v13 = vsel %vm633_vm10, %v634_v14, %v632_v55 }
  0xfe   :  { %714 = vst [vmem:[%s1438_s4 + $0x68] sm:$0xff] %v698_v50  ;;  %vm565_vm13 = vmand %vm533_vm14, %vm549_vm12  ;;  %v683_v15 = vand.u32 2147483648, %v1203_v31  ;;  %vm468_vm0 = vcmp.eq.s32.totalorder %v448_v35, %v1099_v32  ;;  %vm645_vm5 = vcmp.eq.f32.partialorder %v1156_v4, inf  ;;  %vm463_vm9 = vcmp.eq.s32.totalorder %v433_v23, %v1099_v32 }
  0xff   :  { %v693_v36 = vsel %vm565_vm13, %v635_v13, inf  ;;  %vm540_vm1 = vmand %vm468_vm0, %vm524_vm8  ;;  %v646_v44 = vsel %vm645_vm5, %v1156_v4, %v644_v53  ;;  %v658_v61 = vmul.f32 %v764_v25, %v1226_v42  ;;  %v648_v20 = vand.u32 2147483648, %v1156_v4 }
 0x100   :  { %v766_v8 = vpop.eup %765  ;;  %709 = vst [vmem:[%s1438_s4 + $0x40] sm:$0xff] %v693_v36  ;;  %v684_v58 = vsel %vm682_vm7, %v683_v15, %v681_v11  ;;  %vm572_vm12 = vmand %vm540_vm1, %vm556_vm2  ;;  %vm521_vm8 = vcmp.lt.s32.totalorder %v1018_v45, %v964_v56  ;;  %v486_v16 = vadd.s32 112, %v960_v51  ;;  %vm551_vm3 = vcmp.lt.f32.partialorder %v1156_v4, 25.0  ;;  %v439_v7 = vpop.permute.xlu1 %438 }
 0x101   :  { %v700_v54 = vsel %vm572_vm12, %v684_v58, inf  ;;  %vm535_vm10 = vmand %vm463_vm9, %vm519_vm15  ;;  %vm647_vm11 = vcmp.eq.f32.partialorder %v1156_v4, 0.0  ;;  %vm659_vm4 = vcmp.eq.f32.partialorder %v1226_v42, inf  ;;  %v672_v59 = vmul.f32 %v766_v8, %v1269_v34 }
 0x102   :  { %716 = vst [vmem:[%s1438_s4 + $0x78] sm:$0xff] %v700_v54  ;;  %vm567_vm2 = vmand %vm535_vm10, %vm551_vm3  ;;  %v649_v31 = vsel %vm647_vm11, %v648_v20, %v646_v44  ;;  %v660_v51 = vsel %vm659_vm4, %v1226_v42, %v658_v61  ;;  %vm465_vm15 = vcmp.eq.s32.totalorder %v439_v7, %v1099_v32  ;;  %v662_v26 = vand.u32 2147483648, %v1226_v42 }
 0x103   :  { %v695_v63 = vsel %vm567_vm2, %v649_v31, inf  ;;  %vm537_vm6 = vmand %vm465_vm15, %vm521_vm8  ;;  %vm553_vm14 = vcmp.lt.f32.partialorder %v1226_v42, 25.0  ;;  %vm661_vm7 = vcmp.eq.f32.partialorder %v1226_v42, 0.0  ;;  %vm523_vm0 = vcmp.lt.s32.totalorder %v486_v16, %v964_v56 }
 0x104   :  { %711 = vst [vmem:[%s1438_s4 + $0x50] sm:$0xff] %v695_v63  ;;  %vm569_vm13 = vmand %vm537_vm6, %vm553_vm14  ;;  %v663_v4 = vsel %vm661_vm7, %v662_v26, %v660_v51  ;;  %vm673_vm5 = vcmp.eq.f32.partialorder %v1269_v34, inf  ;;  %v445_v21 = vpop.permute.xlu1 %444  ;;  %v676_v45 = vand.u32 2147483648, %v1269_v34  ;;  %vm555_vm12 = vcmp.lt.f32.partialorder %v1269_v34, 25.0 }
 0x105   :  { %v697_v22 = vsel %vm569_vm13, %v663_v4, inf  ;;  %v674_v0 = vsel %vm673_vm5, %v1269_v34, %v672_v59  ;;  %vm467_vm1 = vcmp.eq.s32.totalorder %v445_v21, %v1099_v32  ;;  %vm675_vm8 = vcmp.eq.f32.partialorder %v1269_v34, 0.0 }
 0x106   :  { %713 = vst [vmem:[%s1438_s4 + $0x60] sm:$0xff] %v697_v22  ;;  %vm539_vm9 = vmand %vm467_vm1, %vm523_vm0  ;;  %v677_v56 = vsel %vm675_vm8, %v676_v45, %v674_v0 }
 0x107   :  { %vm571_vm10 = vmand %vm539_vm9, %vm555_vm12 }
 0x108   :  { %v699_v42 = vsel %vm571_vm10, %v677_v56, inf }
 0x109   :  { %715 = vst [vmem:[%s1438_s4 + $0x70] sm:$0xff] %v699_v42 }

// kernel: prepare_inputs.3
= control target key start
LH: loop header
LB: loop body
LE: loop exit
PB: predicated region body
PF: predicated region fallthrough
CT: control target
= control target key end

     0   :  { %s428_s0 = inlined_call_operand.vmem [shape: s32[8], index: 0, kind: input, shape index: {}]   ;;  %s429_s1 = inlined_call_operand.vmem [shape: f32[16,1,128], index: 1, kind: input, shape index: {}]   ;;  %s430_s2 = inlined_call_operand.hbm [shape: f32[8,1,128], index: 2, kind: output, shape index: {}]  }
   0x1   :  { %s7_s11 = sshll.u32 %s428_s0, 4  ;;  %s8_s11 = int_to_ptr.vmem [resolvable:$true] %s7_s11 }
   0x2   :  { %s236_s12 = scalar_lea.vmem %s8_s11, 16  ;;  %p241_p1 = scmp.lt.s32.totalorder %s8_s11, %s8_s11 }
   0x3   :  { %p237_p0 = scmp.ne.s32.totalorder %s8_s11, %s236_s12  ;;  %p242_p2 = scmp.lt.s32.totalorder %s236_s12, %s236_s12 }
   0x5   :  { %p243_p3 = por %p242_p2, %p241_p1 }
   0x7   :  { %p244_p4 = pnand %p243_p3, %p237_p0 }
   0x9   :  { %247 = shalt.err (!%p244_p4)  }
   0xa   :  { %s314_s13 = smov [#allocation3]  }
   0xb   :  { %10 = dma.vmem_to_smem %s8_s11, 16, %s314_s13, [#allocation2] }
   0xc   :  { %292 = dma.done.wait [#allocation2], 16 }
   0xd   :  { %293 = vsyncadd [#allocation2], 4294967280 }
   0xe   :  { %12 = sfence }
   0xf   :  { %13 = vsyncpa [#allocation5], 0 }
  0x10   :  { %15 = vsyncpa [#allocation5 + $0x1], 0  ;;  %s334_s14 = smov 0   ;;  %s336_s15 = smov 0  }
  0x11   :  { %s338_s0 = smov 0   ;;  %s340_s16 = smov 0  }
  0x12 LB: > { %s188_s17 = sadd.s32 4294967295, %s312_s16   ;;  %s189_s18 = sadd.s32 4294967294, %s312_s16   ;;  %s312_s16 = sphi %s340_s16, %s436_s16   ;;  %s308_s0 = sphi %s338_s0, %s435_s0   ;;  %s304_s15 = sphi %s336_s15, %s434_s15   ;;  %s300_s14 = sphi %s334_s14, %s433_s14  }
  0x13   : > { %s357_s19 = sadd.s32 1, %s312_s16   ;;  %s56_s20 = sadd.s32 1, %s308_s0 }
  0x14   : > { %s53_s21 = ssub.s32 %s312_s16, %s357_s19  ;;  %p66_p5 = scmp.ne.s32.totalorder %s308_s0, %s304_s15 }
  0x15   : > { %p54_p6 = scmp.eq.s32.totalorder %s53_s21, 0  ;;  %p67_p7 = scmp.eq.s32.totalorder %s188_s17, 7 }
  0x16   : > { %p72_p8 = scmp.ne.s32.totalorder %s304_s15, %s300_s14  ;;  %p73_p9 = scmp.eq.s32.totalorder %s189_s18, 7 }
  0x17   : > { %s367_s22 = scalar_select %p54_p6, %s308_s0, %s56_s20  }
  0x18   : > { %p369_p10 = por %p67_p7, %p66_p5  ;;  %p373_p11 = por %p73_p9, %p72_p8 }
  0x19   : > { %p192_p12 = scmp.ge.s32.totalorder %s312_s16, 1  ;;  %p99_p13 = scmp.lt.s32.totalorder %s312_s16, 9 }
  0x1b   : > { %p100_p0 = pnand %p192_p12, %p99_p13 }
  0x1c   : > { %s115_s25 = sand.u32 (!%p100_p0), 1, %s304_s15   ;;  %s117_s26 = sld [smem:[#allocation3 + %s188_s17]] (!%p100_p0) }
  0x1d   : > { %103 = sbr.rel (%p100_p0) target bundleno = 55 (0x37), region = 24  ;;  %s116_s27 = scalar_lea.vmem (!%p100_p0), [#allocation4], %s115_s25 }
  0x1e   : > { %s137_s28 = sshll.u32 (!%p100_p0), %s116_s27, 4  ;;  %s193_s29 = sshll.u32 (!%p100_p0), %s188_s17, 4  ;;  %s380_s28 = int_to_ptr.vmem [resolvable:$true] %s137_s28 }
  0x1f   : > { %s388_s7 = scalar_lea.hbm (!%p100_p0), %s430_s2, %s193_s29  ;;  %s125_s8 = scalar_lea.sflag (!%p100_p0), [#allocation5], %s115_s25 }
  0x20   : > { %s248_s9 = scalar_lea.vmem (!%p100_p0), %s380_s28, 16  ;;  %s315_s10 = smov (!%p100_p0), [#allocation4]  }
  0x21   : > { %p249_p2 = scmp.ne.s32.totalorder (!%p100_p0), %s380_s28, %s248_s9  ;;  %s252_s11 = sshll.u32 (!%p100_p0), %s315_s10, 4  ;;  %s253_s11 = int_to_ptr.vmem [resolvable:$false] %s252_s11 }
  0x22   : > { %p118_p1 = scmp.lt.s32.totalorder (!%p100_p0), %s117_s26, 15  ;;  %s254_s12 = scalar_lea.vmem (!%p100_p0), %s253_s11, 32 }
  0x23   : > { %p250_p3 = pnand (!%p100_p0), %p249_p2, %p369_p10  ;;  %p255_p5 = scmp.lt.s32.totalorder (!%p100_p0), %s380_s28, %s253_s11 }
  0x24   : > { %s438_s26 = smov (!%p118_p1, %s117_s26), 15  ;;  %p256_p6 = scmp.lt.s32.totalorder %s254_s12, %s248_s9 }
  0x25   : > { %s120_s4 = scalar_lea.vmem %s429_s1, %s438_s26  ;;  %p251_p4 = pneg %p250_p3 }
  0x26   : > { %v122_v0 = vld [vmem:[%s120_s4] sm:$0x1]  ;;  %p257_p7 = por %p256_p6, %p255_p5 }
  0x27   : > { %123 = vst [vmem:[%s116_s27] sm:$0x1] %v122_v0 }
  0x28   : > { %p258_p8 = pnand %p257_p7, %p251_p4 }
  0x2a   : > { %261 = shalt.err (!%p258_p8)
}
  0x2b   : > { %s262_s13 = scalar_lea.hbm %s388_s7, 16  ;;  %s266_s20 = scalar_lea.hbm %s430_s2, 128 }
  0x2c   : > { %p263_p9 = scmp.ne.s32.totalorder %s388_s7, %s262_s13  ;;  %p267_p0 = scmp.lt.u32.totalorder %s388_s7, %s430_s2 }
  0x2d   : > { %p268_p1 = scmp.lt.u32.totalorder %s266_s20, %s262_s13  ;;  %p270_p3 = scmp.lt.u32.totalorder %s262_s13, %s388_s7 }
  0x2e   : > { %p264_p12 = pnand %p263_p9, %p369_p10 }
  0x2f   : > { %p269_p2 = por %p268_p1, %p267_p0 }
  0x30   : > { %p265_p13 = pneg %p264_p12 }
  0x31   : > { %p271_p4 = por %p270_p3, %p269_p2 }
  0x33   : > { %p272_p5 = pnand %p271_p4, %p265_p13 }
  0x35   : > { %275 = shalt.err (!%p272_p5)
}
  0x36   : > { %196 = dma.vmem_to_hbm [thread:$0]  (%p369_p10), %s380_s28, 16, %s388_s7, %s125_s8  }
  0x37 PF: > { %p202_p6 = scmp.ge.s32.totalorder %s312_s16, 2  ;;  %s149_s26 = sand.u32 1, %s300_s14  }
  0x38   : > { %s150_s27 = scalar_lea.sflag [#allocation5], %s149_s26 }
  0x39   : > { %p199_p7 = pnand %p202_p6, %p373_p11 }
  0x3b   : > { %295 = dma.done.wait (!%p199_p7), %s150_s27, 16  }
  0x3c   : > { %297 = vsyncadd (!%p199_p7), %s150_s27, 4294967280  ;;  %p18_p8 = scmp.ge.s32.totalorder %s357_s19, 10   ;;  %s433_s14 = smov %s304_s15 }
  0x3d   : > { %s434_s15 = smov %s308_s0  ;;  %s435_s0 = smov %s367_s22 }
  0x3e   : > { %s436_s16 = smov %s357_s19  ;;  %20 = sbr.rel (!%p18_p8) target bundleno = 18 (0x12), region = 59 }
  0x45   :  { %154 = vsyncpa [#allocation5], 1 }
  0x46   :  { %156 = vsyncpa [#allocation5 + $0x1], 1 }

// kernel: sub.3
= control target key start
LH: loop header
LB: loop body
LE: loop exit
PB: predicated region body
PF: predicated region fallthrough
CT: control target
= control target key end

     0   :  { %s100_s0 = inlined_call_operand.vmem [shape: f32[28,3], index: 0, kind: input, shape index: {}]   ;;  %s101_s1 = inlined_call_operand.vmem [shape: f32[28,3], index: 1, kind: input, shape index: {}]   ;;  %s102_s2 = inlined_call_operand.vmem [shape: f32[28,3], index: 2, kind: output, shape index: {}]  }
   0x1   :  { %v3_v0 = vld [vmem:[%s100_s0] sm:$0xff]  ;;  %v40_v2 = vld [vmem:[%s100_s0 + $0x8] sm:$0xff]  ;;  %v43_v5 = vld [vmem:[%s100_s0 + $0x10] sm:$0xff] }
   0x2   :  { %v4_v1 = vld [vmem:[%s101_s1] sm:$0xff]  ;;  %v41_v4 = vld [vmem:[%s101_s1 + $0x8] sm:$0xff]  ;;  %v44_v6 = vld [vmem:[%s101_s1 + $0x10] sm:$0xff] }
   0x3   :  { %v7_v3 = vsub.f32 %v3_v0, %v4_v1  ;;  %v16_v7 = vsub.f32 %v40_v2, %v41_v4  ;;  %v26_v8 = vsub.f32 %v43_v5, %v44_v6  ;;  %v46_v9 = vld [vmem:[%s100_s0 + $0x18] sm:$0xff] }
   0x4   :  { %v47_v10 = vld [vmem:[%s101_s1 + $0x18] sm:$0xff] }
   0x5   :  { %9 = vst [vmem:[%s102_s2] sm:$0xff] %v7_v3  ;;  %v36_v11 = vsub.f32 %v46_v9, %v47_v10  ;;  %42 = vst [vmem:[%s102_s2 + $0x8] sm:$0xff] %v16_v7 }
   0x6   :  { %45 = vst [vmem:[%s102_s2 + $0x10] sm:$0xff] %v26_v8 }
   0x7   :  { %48 = vst [vmem:[%s102_s2 + $0x18] sm:$0xff] %v36_v11 }

</bundles_post_ra>
